<compile_context>
chip_gen: v5e
topology: v5e:2x2
jax: 0.10.0
libtpu: 0.0.40
codegen_flags: <defaults>
</compile_context>

<pallas_src>
import jax
import jax.numpy as jnp
from jax.experimental import pallas as pl
from jax.experimental.pallas import tpu as pltpu

LANES = 128        # lane width (vreg)
SUBLANES = 8       # sublane height (vreg)
MAX_TILE_R = 2048  # 2048*128*4B = 1 MiB per input per block


def _partial_kernel(tile_r):
    """Per-tile partial sums.  Tiles are always fully valid: no masks, no pads."""
    n_sub = tile_r // SUBLANES

    def kernel(p_ref, g_ref, sg_ref, spg_ref, bce_ref):
        i = pl.program_id(0)

        p = p_ref[...].astype(jnp.float32)
        g = g_ref[...].astype(jnp.float32)

        # One EUP exp shared between the sigmoid and the stable BCE tail.
        t = jnp.exp(-jnp.abs(p))                    # exp(-|x|) in (0, 1]
        inv = pl.reciprocal(1.0 + t, approx=True)   # EUP slot, frees VALU
        # sigmoid(x) = 1/(1+e^-x) = inv for x>=0, t*inv for x<0
        s = jnp.where(p >= 0, inv, t * inv)
        # BCE with logits: max(x,0) - x*z + log(1 + exp(-|x|))
        bce = jnp.maximum(p, 0.0) - p * g + jnp.log1p(t)

        def fold(x):
            # (tile_r, 128) -> (8, 128): free re-tiling + leading-axis vector adds
            return x.reshape(n_sub, SUBLANES, LANES).sum(axis=0)

        @pl.when(i == 0)
        def _():
            sg_ref[...] = jnp.zeros_like(sg_ref)
            spg_ref[...] = jnp.zeros_like(spg_ref)
            bce_ref[...] = jnp.zeros_like(bce_ref)

        sg_ref[...] += fold(s * g)     # intersection: sigmoid * gt
        spg_ref[...] += fold(s + g)    # union channel: sum(sigmoid) + sum(gt)
        bce_ref[...] += fold(bce)      # bce sum

    return kernel


def _partial_sums_jax(p, g):
    """Pure-JAX partials for the tiny ragged tail (and degenerate tiny inputs)."""
    p = p.astype(jnp.float32)
    g = g.astype(jnp.float32)
    t = jnp.exp(-jnp.abs(p))
    inv = 1.0 / (1.0 + t)
    s = jnp.where(p >= 0, inv, t * inv)
    bce = jnp.maximum(p, 0.0) - p * g + jnp.log1p(t)
    return jnp.sum(s * g), jnp.sum(s) + jnp.sum(g), jnp.sum(bce)


def bce_dice_loss_with_logits(predictions, ground_truth,
                              reduction="mean",
                              bce_weight=0.4,
                              dice_weight=1.0,
                              class_weights=None):
    assert predictions.shape == ground_truth.shape
    assert class_weights is None  # TODO(synk): per-class weight tensor not supported
    n_valid = predictions.size

    p_flat = predictions.reshape(-1)
    g_flat = ground_truth.reshape(-1)

    rows_total = n_valid // LANES                      # full lane rows
    rows8 = (rows_total // SUBLANES) * SUBLANES        # rows the kernel handles
    rem_lane = n_valid - rows_total * LANES            # <128 leftover elements

    inter = jnp.float32(0.0)
    union = jnp.float32(0.0)
    bce_sum = jnp.float32(0.0)

    rows_kernel = 0
    if rows8 > 0:
        tile_r = min(rows8, MAX_TILE_R)                # multiple of 8 by construction
        num_tiles = rows8 // tile_r
        rows_kernel = num_tiles * tile_r

        if rem_lane == 0:
            p2 = p_flat.reshape(rows_total, LANES)     # free reshape, no copy
            g2 = g_flat.reshape(rows_total, LANES)
        else:
            # Rare (numel not a multiple of 128): one prefix-slice copy.
            p2 = p_flat[:rows_total * LANES].reshape(rows_total, LANES)
            g2 = g_flat[:rows_total * LANES].reshape(rows_total, LANES)

        tile_spec = pl.BlockSpec((tile_r, LANES), lambda i: (i, 0))
        acc_spec = pl.BlockSpec((SUBLANES, LANES), lambda i: (0, 0))
        acc_shape = jax.ShapeDtypeStruct((SUBLANES, LANES), jnp.float32)

        out_sg, out_spg, out_bce = pl.pallas_call(
            _partial_kernel(tile_r),
            out_shape=(acc_shape, acc_shape, acc_shape),
            grid=(num_tiles,),
            in_specs=[tile_spec, tile_spec],
            out_specs=(acc_spec, acc_spec, acc_spec),
            compiler_params=pltpu.CompilerParams(
                dimension_semantics=("arbitrary",)),
        )(p2, g2)

        inter += jnp.sum(out_sg)
        union += jnp.sum(out_spg)
        bce_sum += jnp.sum(out_bce)

    handled = rows_kernel * LANES
    if handled < n_valid:
        # Ragged tail: < tile_r*128 + 1023 elements, tiny fused-JAX reduction.
        tsg, tspg, tbce = _partial_sums_jax(p_flat[handled:], g_flat[handled:])
        inter += tsg
        union += tspg
        bce_sum += tbce

    dice_loss = 1.0 - 2.0 * inter / union  # no smoothing eps (matches reference)

    if reduction == "mean":
        bce_loss = bce_sum / n_valid
    elif reduction == "sum":
        bce_loss = bce_sum
    else:
        raise NotImplementedError(reduction)  # TODO(synk): 'none' returns a full tensor

    return bce_loss * bce_weight + dice_loss * dice_weight


def _reference(predictions, ground_truth, bce_weight=0.4, dice_weight=1.0):
    s = jax.nn.sigmoid(predictions)
    intersection = jnp.sum(s * ground_truth)
    union = jnp.sum(s) + jnp.sum(ground_truth)
    dice = 1.0 - 2.0 * intersection / union
    bce = jnp.mean(jnp.maximum(predictions, 0) - predictions * ground_truth
                   + jnp.log1p(jnp.exp(-jnp.abs(predictions))))
    return bce * bce_weight + dice * dice_weight


if __name__ == "__main__":
    key = jax.random.PRNGKey(0)
    k1, k2 = jax.random.split(key)
    # NCHW-shaped inputs consistent with a segmentation loss.
    x_shape = (2, 4, 16, 16)
    predictions = jax.random.normal(k1, x_shape, dtype=jnp.float32)
    ground_truth = (jax.random.uniform(k2, x_shape) > 0.5).astype(jnp.float32)

    loss_fn = jax.jit(bce_dice_loss_with_logits)
    loss = loss_fn(predictions, ground_truth)
    loss = jax.block_until_ready(loss)

    ref = _reference(predictions, ground_truth)
    # Tolerance loosened for pl.reciprocal(approx=True) in the sigmoid path.
    assert jnp.allclose(loss, ref, rtol=2e-3, atol=2e-3), (loss, ref)
    print("KERNEL_OK")
</pallas_src>

<mosaic_0001>
module attributes {stable_mosaic.version = 11 : i64} {
  func.func @kernel(%arg0: i32, %arg1: memref<16x128xf32, #tpu.memory_space<vmem>>, %arg2: memref<16x128xf32, #tpu.memory_space<vmem>>, %arg3: memref<8x128xf32, #tpu.memory_space<vmem>>, %arg4: memref<8x128xf32, #tpu.memory_space<vmem>>, %arg5: memref<8x128xf32, #tpu.memory_space<vmem>>) attributes {dimension_semantics = [#tpu.dimension_semantics<arbitrary>], iteration_bounds = array<i64: 1>, scalar_prefetch = 0 : i64, scratch_operands = 0 : i64, tpu.core_type = #tpu.core_type<tc>, window_params = [{transform_indices = @transform_0, window_bounds = array<i64: 16, 128>}, {transform_indices = @transform_1, window_bounds = array<i64: 16, 128>}, {pipeline_mode = #tpu.pipeline_mode<synchronous>, transform_indices = @transform_2, window_bounds = array<i64: 8, 128>}, {pipeline_mode = #tpu.pipeline_mode<synchronous>, transform_indices = @transform_3, window_bounds = array<i64: 8, 128>}, {pipeline_mode = #tpu.pipeline_mode<synchronous>, transform_indices = @transform_4, window_bounds = array<i64: 8, 128>}]} {
    %c0 = arith.constant 0 : index
    %c0_0 = arith.constant 0 : index
    %0 = vector.load %arg1[%c0, %c0_0] : memref<16x128xf32, #tpu.memory_space<vmem>>, vector<16x128xf32>
    %c0_1 = arith.constant 0 : index
    %c0_2 = arith.constant 0 : index
    %1 = vector.load %arg2[%c0_1, %c0_2] : memref<16x128xf32, #tpu.memory_space<vmem>>, vector<16x128xf32>
    %2 = math.absf %0 : vector<16x128xf32>
    %cst = arith.constant 0.000000e+00 : f32
    %3 = vector.broadcast %cst : f32 to vector<16x128xf32>
    %4 = arith.subf %3, %2 : vector<16x128xf32>
    %5 = math.exp %4 : vector<16x128xf32>
    %cst_3 = arith.constant 1.000000e+00 : f32
    %6 = vector.broadcast %cst_3 : f32 to vector<16x128xf32>
    %7 = arith.addf %6, %5 : vector<16x128xf32>
    %8 = tpu.reciprocal %7 {approx = true} : vector<16x128xf32> -> vector<16x128xf32>
    %cst_4 = arith.constant 0.000000e+00 : f32
    %9 = vector.broadcast %cst_4 : f32 to vector<16x128xf32>
    %10 = arith.cmpf oge, %0, %9 : vector<16x128xf32>
    %11 = arith.mulf %5, %8 : vector<16x128xf32>
    %12 = arith.select %10, %8, %11 : vector<16x128xi1>, vector<16x128xf32>
    %cst_5 = arith.constant 0.000000e+00 : f32
    %13 = vector.broadcast %cst_5 : f32 to vector<16x128xf32>
    %14 = arith.maximumf %0, %13 : vector<16x128xf32>
    %15 = arith.mulf %0, %1 : vector<16x128xf32>
    %16 = arith.subf %14, %15 : vector<16x128xf32>
    %17 = math.log1p %5 : vector<16x128xf32>
    %18 = arith.addf %16, %17 : vector<16x128xf32>
    %c0_i32 = arith.constant 0 : i32
    %19 = arith.cmpi eq, %arg0, %c0_i32 : i32
    %20 = arith.extui %19 : i1 to i32
    %c0_i32_6 = arith.constant 0 : i32
    %21 = arith.cmpi ne, %20, %c0_i32_6 : i32
    scf.if %21 {
      %cst_22 = arith.constant 0.000000e+00 : f32
      %39 = vector.broadcast %cst_22 : f32 to vector<8x128xf32>
      %c0_23 = arith.constant 0 : index
      %c0_24 = arith.constant 0 : index
      %40 = vector.load %arg3[%c0_23, %c0_24] : memref<8x128xf32, #tpu.memory_space<vmem>>, vector<8x128xf32>
      tpu.vector_store %arg3[%c0_23, %c0_24], %39 {strides = array<i32>} : memref<8x128xf32, #tpu.memory_space<vmem>>, vector<8x128xf32>,
      %cst_25 = arith.constant 0.000000e+00 : f32
      %41 = vector.broadcast %cst_25 : f32 to vector<8x128xf32>
      %c0_26 = arith.constant 0 : index
      %c0_27 = arith.constant 0 : index
      %42 = vector.load %arg4[%c0_26, %c0_27] : memref<8x128xf32, #tpu.memory_space<vmem>>, vector<8x128xf32>
      tpu.vector_store %arg4[%c0_26, %c0_27], %41 {strides = array<i32>} : memref<8x128xf32, #tpu.memory_space<vmem>>, vector<8x128xf32>,
      %cst_28 = arith.constant 0.000000e+00 : f32
      %43 = vector.broadcast %cst_28 : f32 to vector<8x128xf32>
      %c0_29 = arith.constant 0 : index
      %c0_30 = arith.constant 0 : index
      %44 = vector.load %arg5[%c0_29, %c0_30] : memref<8x128xf32, #tpu.memory_space<vmem>>, vector<8x128xf32>
      tpu.vector_store %arg5[%c0_29, %c0_30], %43 {strides = array<i32>} : memref<8x128xf32, #tpu.memory_space<vmem>>, vector<8x128xf32>,
    } else {
    }
    %c0_7 = arith.constant 0 : index
    %c0_8 = arith.constant 0 : index
    %22 = vector.load %arg3[%c0_7, %c0_8] : memref<8x128xf32, #tpu.memory_space<vmem>>, vector<8x128xf32>
    %23 = arith.mulf %12, %1 : vector<16x128xf32>
    %24 = vector.shape_cast %23 : vector<16x128xf32> to vector<2x8x128xf32>
    %cst_9 = arith.constant dense<0.000000e+00> : vector<8x128xf32>
    %25 = vector.multi_reduction <add>, %24, %cst_9 [0] : vector<2x8x128xf32> to vector<8x128xf32>
    %26 = arith.addf %22, %25 : vector<8x128xf32>
    %c0_10 = arith.constant 0 : index
    %c0_11 = arith.constant 0 : index
    %27 = vector.load %arg3[%c0_10, %c0_11] : memref<8x128xf32, #tpu.memory_space<vmem>>, vector<8x128xf32>
    tpu.vector_store %arg3[%c0_10, %c0_11], %26 {strides = array<i32>} : memref<8x128xf32, #tpu.memory_space<vmem>>, vector<8x128xf32>,
    %c0_12 = arith.constant 0 : index
    %c0_13 = arith.constant 0 : index
    %28 = vector.load %arg4[%c0_12, %c0_13] : memref<8x128xf32, #tpu.memory_space<vmem>>, vector<8x128xf32>
    %29 = arith.addf %12, %1 : vector<16x128xf32>
    %30 = vector.shape_cast %29 : vector<16x128xf32> to vector<2x8x128xf32>
    %cst_14 = arith.constant dense<0.000000e+00> : vector<8x128xf32>
    %31 = vector.multi_reduction <add>, %30, %cst_14 [0] : vector<2x8x128xf32> to vector<8x128xf32>
    %32 = arith.addf %28, %31 : vector<8x128xf32>
    %c0_15 = arith.constant 0 : index
    %c0_16 = arith.constant 0 : index
    %33 = vector.load %arg4[%c0_15, %c0_16] : memref<8x128xf32, #tpu.memory_space<vmem>>, vector<8x128xf32>
    tpu.vector_store %arg4[%c0_15, %c0_16], %32 {strides = array<i32>} : memref<8x128xf32, #tpu.memory_space<vmem>>, vector<8x128xf32>,
    %c0_17 = arith.constant 0 : index
    %c0_18 = arith.constant 0 : index
    %34 = vector.load %arg5[%c0_17, %c0_18] : memref<8x128xf32, #tpu.memory_space<vmem>>, vector<8x128xf32>
    %35 = vector.shape_cast %18 : vector<16x128xf32> to vector<2x8x128xf32>
    %cst_19 = arith.constant dense<0.000000e+00> : vector<8x128xf32>
    %36 = vector.multi_reduction <add>, %35, %cst_19 [0] : vector<2x8x128xf32> to vector<8x128xf32>
    %37 = arith.addf %34, %36 : vector<8x128xf32>
    %c0_20 = arith.constant 0 : index
    %c0_21 = arith.constant 0 : index
    %38 = vector.load %arg5[%c0_20, %c0_21] : memref<8x128xf32, #tpu.memory_space<vmem>>, vector<8x128xf32>
    tpu.vector_store %arg5[%c0_20, %c0_21], %37 {strides = array<i32>} : memref<8x128xf32, #tpu.memory_space<vmem>>, vector<8x128xf32>,
    return
  }
  func.func @transform_0(%arg0: i32) -> (i32, i32) {
    %c0_i32 = arith.constant 0 : i32
    %c0_i32_0 = arith.constant 0 : i32
    return %arg0, %c0_i32 : i32, i32
  }
  func.func @transform_1(%arg0: i32) -> (i32, i32) {
    %c0_i32 = arith.constant 0 : i32
    %c0_i32_0 = arith.constant 0 : i32
    return %arg0, %c0_i32 : i32, i32
  }
  func.func @transform_2(%arg0: i32) -> (i32, i32) {
    %c0_i32 = arith.constant 0 : i32
    %c0_i32_0 = arith.constant 0 : i32
    %c0_i32_1 = arith.constant 0 : i32
    return %c0_i32, %c0_i32_0 : i32, i32
  }
  func.func @transform_3(%arg0: i32) -> (i32, i32) {
    %c0_i32 = arith.constant 0 : i32
    %c0_i32_0 = arith.constant 0 : i32
    %c0_i32_1 = arith.constant 0 : i32
    return %c0_i32, %c0_i32_0 : i32, i32
  }
  func.func @transform_4(%arg0: i32) -> (i32, i32) {
    %c0_i32 = arith.constant 0 : i32
    %c0_i32_0 = arith.constant 0 : i32
    %c0_i32_1 = arith.constant 0 : i32
    return %c0_i32, %c0_i32_0 : i32, i32
  }
}

</mosaic_0001>

<bundles_post_ra>
// kernel: bce_dice_loss_with_logits.1
= control target key start
LH: loop header
LB: loop body
LE: loop exit
PB: predicated region body
PF: predicated region fallthrough
CT: control target
= control target key end

     0   :  { %s156_s0 = inlined_call_operand.vmem [shape: f32[16,128], index: 0, kind: input, shape index: {}]   ;;  %s157_s1 = inlined_call_operand.vmem [shape: f32[16,128], index: 1, kind: input, shape index: {}]   ;;  %s158_s2 = inlined_call_operand.vmem [shape: f32[8,128], index: 2, kind: output, shape index: {0}]   ;;  %s159_s3 = inlined_call_operand.vmem [shape: f32[8,128], index: 3, kind: output, shape index: {1}]   ;;  %s160_s4 = inlined_call_operand.vmem [shape: f32[8,128], index: 4, kind: output, shape index: {2}]  }
   0x1   :  { %v14_v0 = vld [vmem:[%s156_s0] sm:$0xff]  ;;  %v15_v1 = vld [vmem:[%s156_s0 + $0x8] sm:$0xff] }
   0x2   :  { %v18_v2 = vand.u32 2147483647, %v14_v0  ;;  %v19_v3 = vand.u32 2147483647, %v15_v1  ;;  %v16_v14 = vld [vmem:[%s157_s1] sm:$0xff]  ;;  %v17_v15 = vld [vmem:[%s157_s1 + $0x8] sm:$0xff] }
   0x3   :  { %v36_v17 = vmax.f32 %v14_v0, 0.0  ;;  %v38_v18 = vmul.f32 %v16_v14, %v14_v0  ;;  %v37_v21 = vmax.f32 %v15_v1, 0.0  ;;  %v39_v22 = vmul.f32 %v17_v15, %v15_v1 }
   0x4   :  { %v20_v4 = vsub.f32 0.0, %v18_v2  ;;  %v21_v5 = vsub.f32 0.0, %v19_v3  ;;  %vm30_vm0 = vcmp.ge.f32.partialorder %v14_v0, 0.0  ;;  %vm31_vm1 = vcmp.ge.f32.partialorder %v15_v1, 0.0 }
   0x5   :  { %v40_v30 = vsub.f32 %v36_v17, %v38_v18  ;;  %v41_v34 = vsub.f32 %v37_v21, %v39_v22 }
   0x6   :  { %v22_v6 = vmul.f32 1.442695, %v20_v4  ;;  %v24_v7 = vmul.f32 1.442695, %v21_v5 }
   0x8   :  { %98 = vpow2.f32 %v22_v6 }
   0x9   :  { %100 = vpow2.f32 %v24_v7 }
   0xe   :  { %v99_v8 = vpop.eup %98 }
   0xf   :  { %v101_v9 = vpop.eup %100  ;;  %v26_v10 = vadd.f32 1.0, %v99_v8  ;;  %v45_v12 = vmul.f32 -0.5, %v99_v8  ;;  %v48_v19 = vand.u32 2147483647, %v99_v8 }
  0x10   :  { %v27_v11 = vadd.f32 1.0, %v101_v9  ;;  %v54_v13 = vmul.f32 -0.5, %v101_v9  ;;  %v57_v23 = vand.u32 2147483647, %v101_v9 }
  0x11   :  { %102 = vrcp.f32 %v26_v10  ;;  %v46_v16 = vadd.f32 1.0, %v45_v12  ;;  %vm49_vm2 = vcmp.lt.f32.partialorder %v48_v19, 0.0004427343 }
  0x12   :  { %104 = vrcp.f32 %v27_v11  ;;  %v55_v20 = vadd.f32 1.0, %v54_v13  ;;  %vm58_vm3 = vcmp.lt.f32.partialorder %v57_v23, 0.0004427343 }
  0x13   :  { %106 = vlog2.f32 %v26_v10  ;;  %v47_v27 = vmul.f32 %v99_v8, %v46_v16 }
  0x14   :  { %108 = vlog2.f32 %v27_v11  ;;  %v56_v31 = vmul.f32 %v101_v9, %v55_v20 }
  0x17   :  { %v103_v24 = vpop.eup %102 }
  0x18   :  { %v105_v25 = vpop.eup %104  ;;  %v32_v26 = vmul.f32 %v103_v24, %v99_v8 }
  0x19   :  { %v107_v28 = vpop.eup %106  ;;  %v33_v29 = vmul.f32 %v105_v25, %v101_v9 }
  0x1a   :  { %v109_v32 = vpop.eup %108  ;;  %v34_v33 = vsel %vm30_vm0, %v103_v24, %v32_v26  ;;  %v44_v35 = vmul.f32 0.6931472, %v107_v28 }
  0x1b   :  { %v35_v36 = vsel %vm31_vm1, %v105_v25, %v33_v29  ;;  %v70_v37 = vmul.f32 %v34_v33, %v16_v14  ;;  %v76_v38 = vadd.f32 %v34_v33, %v16_v14  ;;  %v53_v39 = vmul.f32 0.6931472, %v109_v32 }
  0x1c   :  { %v71_v40 = vmul.f32 %v35_v36, %v17_v15  ;;  %v77_v41 = vadd.f32 %v35_v36, %v17_v15  ;;  %v50_v42 = vsel %vm49_vm2, %v47_v27, %v44_v35 }
  0x1d   :  { %v59_v43 = vsel %vm58_vm3, %v56_v31, %v53_v39  ;;  %v60_v44 = vadd.f32 %v50_v42, %v40_v30 }
  0x1e   :  { %v72_v45 = vadd.f32 %v71_v40, %v70_v37  ;;  %v78_v46 = vadd.f32 %v77_v41, %v76_v38  ;;  %v61_v47 = vadd.f32 %v59_v43, %v41_v34 }
  0x20   :  { %v82_v48 = vadd.f32 %v61_v47, %v60_v44  ;;  %74 = vst [vmem:[%s158_s2] sm:$0xff] %v72_v45 }
  0x21   :  { %80 = vst [vmem:[%s159_s3] sm:$0xff] %v78_v46 }
  0x22   :  { %84 = vst [vmem:[%s160_s4] sm:$0xff] %v82_v48 }

</bundles_post_ra>
